<compile_context>
chip_gen: v5e
topology: v5e:2x2
jax: 0.10.0
libtpu: 0.0.40
codegen_flags: <defaults>
</compile_context>

<pallas_src>
import functools

import jax
import jax.numpy as jnp
from jax.experimental import pallas as pl
from jax.experimental.pallas import tpu as pltpu


def _attention_kernel(src_ref, tgt_ref, w1t_ref, w2t_ref, out_ref, ts_ref, *,
                      approx_reciprocal):
    # src_ref : (Bb, S,  Ds)   tgt_ref : (Bb, Tt, Dt)
    # w1t_ref : (Ds, A)        w2t_ref : (Dt, A)        (pre-transposed weights)
    # out_ref : (Bb, Tt, Ds)   ts_ref  : (Bb, S,  A)    (cached source proj.)
    bb, S, Ds = src_ref.shape
    _, Tt, Dt = tgt_ref.shape
    A = w1t_ref.shape[1]

    src = src_ref[...]                                   # (Bb, S, Ds)

    # --- Source projection: identical for every target tile of this batch
    #     tile. Compute it once (target axis iterates innermost) and cache it
    #     in VMEM scratch; all other target tiles just read the cache. ---
    @pl.when(pl.program_id(1) == 0)
    def _():
        ts_f32 = jnp.dot(src.reshape(bb * S, Ds), w1t_ref[...],
                         preferred_element_type=jnp.float32)   # (Bb*S, A)
        ts_ref[...] = ts_f32.reshape(bb, S, A).astype(ts_ref.dtype)

    # --- Target projection: one big MXU matmul for the tile (M = Bb*Tt). ---
    tgt = tgt_ref[...]                                   # (Bb, Tt, Dt)
    tt = jnp.dot(tgt.reshape(bb * Tt, Dt), w2t_ref[...],
                 preferred_element_type=jnp.float32)     # (Bb*Tt, A), f32 acc
    tt = tt.reshape(bb, Tt, A).astype(tgt.dtype)

    ts = ts_ref[...]                                     # (Bb, S, A)

    # --- Multiplicative scores, laid out (b, t, s): softmax axis == lane axis,
    #     no transposes (contracting dims expressed directly in the einsum). ---
    scores = jnp.einsum('bta,bsa->bts', tt, ts,
                        preferred_element_type=jnp.float32)   # (Bb, Tt, S) f32

    # --- Softmax over the source axis (f32 math). ---
    m = jnp.max(scores, axis=-1, keepdims=True)
    e = jnp.exp(scores - m)
    denom = jnp.sum(e, axis=-1, keepdims=True)
    w = e * pl.reciprocal(denom, approx=approx_reciprocal)    # (Bb, Tt, S)

    # --- Attention vectors: out[b,t,:] = sum_s w[b,t,s] * src[b,s,:].
    #     Native (Tt,S)@(S,Ds) per batch -- no `w.T` needed. ---
    out = jnp.einsum('bts,bsd->btd', w.astype(src.dtype), src,
                     preferred_element_type=jnp.float32)      # (Bb, Tt, Ds) f32
    out_ref[...] = out.astype(out_ref.dtype)

    # TODO(synk): additive attention variant (<v, tanh(W1.h_e + W2.h_d)>) is not
    # implemented; only the module default is_multiplicative=True is reproduced.
    # TODO(synk): when Ds < 128 the output store is a masked partial store; for
    # large store-bound workloads pad Ds / fuse batch into the lane axis.


def attention_forward(source, target, W1, W2, *, matmul_dtype=None,
                      batch_block=None, target_block=None):
    """source: (S, B, Ds), target: (T, B, Dt), W1: (A, Ds), W2: (A, Dt)
    returns: (T, B, Ds) in the dtype of `source`.

    matmul_dtype: optional dtype (e.g. jnp.bfloat16) to cast the matmul
      operands to; accumulation and softmax math stay in float32.
    batch_block / target_block: grid tile sizes (must divide B / T); default is
      the full extent (single tile) -- shrink them for long sequences / v7x's
      smaller VMEM.
    """
    S, B, Ds = source.shape
    T, _, Dt = target.shape
    A = W1.shape[0]
    out_dtype = source.dtype

    if matmul_dtype is not None:
        source = source.astype(matmul_dtype)
        target = target.astype(matmul_dtype)
        W1 = W1.astype(matmul_dtype)
        W2 = W2.astype(matmul_dtype)

    # Pre-transpose the weights once (no per-grid-step `.T` inside the kernel).
    W1t = W1.T                                  # (Ds, A)
    W2t = W2.T                                  # (Dt, A)

    # Batch-major layout keeps every in-kernel contraction a leading-batch,
    # transpose-free MXU dot and keeps all BlockSpec (sublane, lane) dims equal
    # to full array dims.
    # TODO(synk): for strongly memory-bound shapes these layout transposes could
    # be folded away with strided per-batch DMA (pl.ANY + manual copies); only
    # worthwhile once Ds * itemsize >= ~512 B per row.
    src_b = jnp.transpose(source, (1, 0, 2))    # (B, S, Ds)
    tgt_b = jnp.transpose(target, (1, 0, 2))    # (B, T, Dt)

    bb = batch_block if batch_block is not None else B
    tb = target_block if target_block is not None else T
    assert B % bb == 0, "batch_block must divide B"
    assert T % tb == 0, "target_block must divide T"
    grid = (B // bb, T // tb)

    # Advisory cost estimate so XLA can schedule neighbors around the call.
    itemsize_in = jnp.dtype(src_b.dtype).itemsize
    cost = pl.CostEstimate(
        flops=int(2 * B * (S * Ds * A + T * Dt * A + S * T * A + S * T * Ds)),
        transcendentals=int(B * S * T),
        bytes_accessed=int((src_b.size + tgt_b.size + W1t.size + W2t.size)
                           * itemsize_in
                           + B * T * Ds * jnp.dtype(out_dtype).itemsize),
    )

    # Approximate (EUP) reciprocal only when matmul operands are already
    # low-precision; the f32 path keeps exact reciprocal+multiply (1e-5 fidelity).
    use_approx_recip = (matmul_dtype is not None
                        and jnp.dtype(matmul_dtype).itemsize < 4)

    kernel = functools.partial(_attention_kernel,
                               approx_reciprocal=use_approx_recip)

    out_b = pl.pallas_call(
        kernel,
        out_shape=jax.ShapeDtypeStruct((B, T, Ds), out_dtype),
        grid_spec=pltpu.PrefetchScalarGridSpec(
            num_scalar_prefetch=0,
            grid=grid,
            in_specs=[
                pl.BlockSpec((bb, S, Ds), lambda b, t: (b, 0, 0)),
                pl.BlockSpec((bb, tb, Dt), lambda b, t: (b, t, 0)),
                pl.BlockSpec((Ds, A), lambda b, t: (0, 0)),
                pl.BlockSpec((Dt, A), lambda b, t: (0, 0)),
            ],
            out_specs=pl.BlockSpec((bb, tb, Ds), lambda b, t: (b, t, 0)),
            scratch_shapes=[pltpu.VMEM((bb, S, A), src_b.dtype)],
        ),
        compiler_params=pltpu.CompilerParams(
            # Batch axis sharded across cores; target axis is "arbitrary"
            # because the cached source projection carries a dependency along it.
            dimension_semantics=("parallel", "arbitrary"),
            vmem_limit_bytes=64 * 1024 * 1024),
        cost_estimate=cost,
    )(src_b, tgt_b, W1t, W2t)

    return jnp.transpose(out_b, (1, 0, 2))      # (T, B, Ds)


def attention_reference(source, target, W1, W2):
    """Pure-JAX reference mirroring the PyTorch forward (f32)."""
    ts = jnp.einsum('sbd,ad->sba', source, W1)           # (S, B, A)
    tt = jnp.einsum('tbd,ad->tba', target, W2)           # (T, B, A)
    scores = jnp.einsum('sba,tba->stb', ts, tt)          # (S, T, B)
    weights = jax.nn.softmax(scores, axis=0)             # softmax over source len
    return jnp.einsum('stb,sbd->tbd', weights, source)   # (T, B, Ds)


if __name__ == "__main__":
    # Small shapes consistent with the module's forward signature.
    S, T, B = 8, 8, 2
    source_size, target_size, attention_size = 32, 32, 32

    key = jax.random.PRNGKey(0)
    k1, k2, k3, k4 = jax.random.split(key, 4)

    # Deterministic parameter init (shapes match nn.Linear(in, out, bias=False).weight).
    bound1 = 1.0 / jnp.sqrt(source_size)
    bound2 = 1.0 / jnp.sqrt(target_size)
    W1 = jax.random.uniform(k1, (attention_size, source_size),
                            jnp.float32, -bound1, bound1)
    W2 = jax.random.uniform(k2, (attention_size, target_size),
                            jnp.float32, -bound2, bound2)

    source = jax.random.normal(k3, (S, B, source_size), jnp.float32)
    target = jax.random.normal(k4, (T, B, target_size), jnp.float32)

    ref = attention_reference(source, target, W1, W2)

    # Full-precision path: faithful to the PyTorch module (f32 everywhere).
    out = attention_forward(source, target, W1, W2)
    out = jax.block_until_ready(out)
    assert out.shape == (T, B, source_size)
    assert jnp.allclose(out, ref, atol=1e-5, rtol=1e-5), "f32 mismatch vs reference"

    # Tiled-grid path (exercises the cached source projection across target tiles).
    out_tiled = attention_forward(source, target, W1, W2,
                                  batch_block=1, target_block=T // 2)
    out_tiled = jax.block_until_ready(out_tiled)
    assert jnp.allclose(out_tiled, ref, atol=1e-5, rtol=1e-5), "tiled mismatch vs reference"

    # Fast path: bf16 matmul operands, f32 accumulation + f32 softmax math.
    out_bf16 = attention_forward(source, target, W1, W2,
                                 matmul_dtype=jnp.bfloat16)
    out_bf16 = jax.block_until_ready(out_bf16)
    assert out_bf16.shape == (T, B, source_size)
    assert jnp.allclose(out_bf16, ref, atol=3e-2, rtol=3e-2), "bf16 mismatch vs reference"

    print("KERNEL_OK")
</pallas_src>

<mosaic_0001>
module attributes {stable_mosaic.version = 11 : i64} {
  func.func @_attention_kernel(%arg0: i32, %arg1: i32, %arg2: memref<2x8x32xf32, #tpu.memory_space<vmem>>, %arg3: memref<2x8x32xf32, #tpu.memory_space<vmem>>, %arg4: memref<32x32xf32, #tpu.memory_space<vmem>>, %arg5: memref<32x32xf32, #tpu.memory_space<vmem>>, %arg6: memref<2x8x32xf32, #tpu.memory_space<vmem>>, %arg7: memref<2x8x32xf32, #tpu.memory_space<vmem>>) attributes {dimension_semantics = [#tpu.dimension_semantics<parallel>, #tpu.dimension_semantics<arbitrary>], iteration_bounds = array<i64: 1, 1>, scalar_prefetch = 0 : i64, scratch_operands = 1 : i64, tpu.core_type = #tpu.core_type<tc>, window_params = [{transform_indices = @transform_0, window_bounds = array<i64: 2, 8, 32>}, {transform_indices = @transform_1, window_bounds = array<i64: 2, 8, 32>}, {pipeline_mode = #tpu.pipeline_mode<synchronous>, transform_indices = @transform_2, window_bounds = array<i64: 32, 32>}, {pipeline_mode = #tpu.pipeline_mode<synchronous>, transform_indices = @transform_3, window_bounds = array<i64: 32, 32>}, {transform_indices = @transform_4, window_bounds = array<i64: 2, 8, 32>}]} {
    %c0 = arith.constant 0 : index
    %c0_0 = arith.constant 0 : index
    %c0_1 = arith.constant 0 : index
    %0 = vector.load %arg2[%c0, %c0_0, %c0_1] : memref<2x8x32xf32, #tpu.memory_space<vmem>>, vector<2x8x32xf32>
    %c0_i32 = arith.constant 0 : i32
    %1 = arith.cmpi eq, %arg1, %c0_i32 : i32
    %2 = arith.extui %1 : i1 to i32
    %c0_i32_2 = arith.constant 0 : i32
    %3 = arith.cmpi ne, %2, %c0_i32_2 : i32
    scf.if %3 {
      %23 = vector.shape_cast %0 : vector<2x8x32xf32> to vector<16x32xf32>
      %c0_18 = arith.constant 0 : index
      %c0_19 = arith.constant 0 : index
      %24 = vector.load %arg4[%c0_18, %c0_19] : memref<32x32xf32, #tpu.memory_space<vmem>>, vector<32x32xf32>
      %cst_20 = arith.constant dense<0.000000e+00> : vector<16x32xf32>
      %25 = tpu.matmul %23, %24, %cst_20 {dimension_numbers = #tpu.dot_dimension_numbers<[1], [0], [0], [1], [0, 0, 1, 1], [], []>} : vector<16x32xf32>, vector<32x32xf32>, vector<16x32xf32> -> vector<16x32xf32>
      %26 = vector.shape_cast %25 : vector<16x32xf32> to vector<2x8x32xf32>
      %c0_21 = arith.constant 0 : index
      %c0_22 = arith.constant 0 : index
      %c0_23 = arith.constant 0 : index
      %27 = vector.load %arg7[%c0_21, %c0_22, %c0_23] : memref<2x8x32xf32, #tpu.memory_space<vmem>>, vector<2x8x32xf32>
      tpu.vector_store %arg7[%c0_21, %c0_22, %c0_23], %26 {strides = array<i32>} : memref<2x8x32xf32, #tpu.memory_space<vmem>>, vector<2x8x32xf32>,
    } else {
    }
    %c0_3 = arith.constant 0 : index
    %c0_4 = arith.constant 0 : index
    %c0_5 = arith.constant 0 : index
    %4 = vector.load %arg3[%c0_3, %c0_4, %c0_5] : memref<2x8x32xf32, #tpu.memory_space<vmem>>, vector<2x8x32xf32>
    %5 = vector.shape_cast %4 : vector<2x8x32xf32> to vector<16x32xf32>
    %c0_6 = arith.constant 0 : index
    %c0_7 = arith.constant 0 : index
    %6 = vector.load %arg5[%c0_6, %c0_7] : memref<32x32xf32, #tpu.memory_space<vmem>>, vector<32x32xf32>
    %cst = arith.constant dense<0.000000e+00> : vector<16x32xf32>
    %7 = tpu.matmul %5, %6, %cst {dimension_numbers = #tpu.dot_dimension_numbers<[1], [0], [0], [1], [0, 0, 1, 1], [], []>} : vector<16x32xf32>, vector<32x32xf32>, vector<16x32xf32> -> vector<16x32xf32>
    %8 = vector.shape_cast %7 : vector<16x32xf32> to vector<2x8x32xf32>
    %c0_8 = arith.constant 0 : index
    %c0_9 = arith.constant 0 : index
    %c0_10 = arith.constant 0 : index
    %9 = vector.load %arg7[%c0_8, %c0_9, %c0_10] : memref<2x8x32xf32, #tpu.memory_space<vmem>>, vector<2x8x32xf32>
    "tpu.trace_start"() <{level = 10 : i32, message = "bta,bsa->bts"}> : () -> ()
    %cst_11 = arith.constant dense<0.000000e+00> : vector<2x8x8xf32>
    %10 = tpu.matmul %8, %9, %cst_11 {dimension_numbers = #tpu.dot_dimension_numbers<[2], [2], [1], [1], [0, 0, 0, 1, 1, 1], [0], [0]>} : vector<2x8x32xf32>, vector<2x8x32xf32>, vector<2x8x8xf32> -> vector<2x8x8xf32>
    "tpu.trace_stop"() : () -> ()
    %cst_12 = arith.constant dense<0xFF800000> : vector<2x8xf32>
    %11 = vector.multi_reduction <maximumf>, %10, %cst_12 [2] : vector<2x8x8xf32> to vector<2x8xf32>
    %12 = vector.shape_cast %11 : vector<2x8xf32> to vector<2x8x1xf32>
    %13 = vector.broadcast %12 : vector<2x8x1xf32> to vector<2x8x8xf32>
    %14 = arith.subf %10, %13 : vector<2x8x8xf32>
    %15 = math.exp %14 : vector<2x8x8xf32>
    %cst_13 = arith.constant dense<0.000000e+00> : vector<2x8xf32>
    %16 = vector.multi_reduction <add>, %15, %cst_13 [2] : vector<2x8x8xf32> to vector<2x8xf32>
    %17 = vector.shape_cast %16 : vector<2x8xf32> to vector<2x8x1xf32>
    %18 = tpu.reciprocal %17 : vector<2x8x1xf32> -> vector<2x8x1xf32>
    %19 = vector.broadcast %18 : vector<2x8x1xf32> to vector<2x8x8xf32>
    %20 = arith.mulf %15, %19 : vector<2x8x8xf32>
    "tpu.trace_start"() <{level = 10 : i32, message = "bts,bsd->btd"}> : () -> ()
    %cst_14 = arith.constant dense<0.000000e+00> : vector<2x8x32xf32>
    %21 = tpu.matmul %20, %0, %cst_14 {dimension_numbers = #tpu.dot_dimension_numbers<[2], [1], [1], [2], [0, 0, 0, 1, 1, 2], [0], [0]>} : vector<2x8x8xf32>, vector<2x8x32xf32>, vector<2x8x32xf32> -> vector<2x8x32xf32>
    "tpu.trace_stop"() : () -> ()
    %c0_15 = arith.constant 0 : index
    %c0_16 = arith.constant 0 : index
    %c0_17 = arith.constant 0 : index
    %22 = vector.load %arg6[%c0_15, %c0_16, %c0_17] : memref<2x8x32xf32, #tpu.memory_space<vmem>>, vector<2x8x32xf32>
    tpu.vector_store %arg6[%c0_15, %c0_16, %c0_17], %21 {strides = array<i32>} : memref<2x8x32xf32, #tpu.memory_space<vmem>>, vector<2x8x32xf32>,
    return
  }
  func.func @transform_0(%arg0: i32, %arg1: i32) -> (i32, i32, i32) {
    %c0_i32 = arith.constant 0 : i32
    %c0_i32_0 = arith.constant 0 : i32
    %c0_i32_1 = arith.constant 0 : i32
    return %arg0, %c0_i32, %c0_i32_0 : i32, i32, i32
  }
  func.func @transform_1(%arg0: i32, %arg1: i32) -> (i32, i32, i32) {
    %c0_i32 = arith.constant 0 : i32
    %c0_i32_0 = arith.constant 0 : i32
    return %arg0, %arg1, %c0_i32 : i32, i32, i32
  }
  func.func @transform_2(%arg0: i32, %arg1: i32) -> (i32, i32) {
    %c0_i32 = arith.constant 0 : i32
    %c0_i32_0 = arith.constant 0 : i32
    %c0_i32_1 = arith.constant 0 : i32
    return %c0_i32, %c0_i32_0 : i32, i32
  }
  func.func @transform_3(%arg0: i32, %arg1: i32) -> (i32, i32) {
    %c0_i32 = arith.constant 0 : i32
    %c0_i32_0 = arith.constant 0 : i32
    %c0_i32_1 = arith.constant 0 : i32
    return %c0_i32, %c0_i32_0 : i32, i32
  }
  func.func @transform_4(%arg0: i32, %arg1: i32) -> (i32, i32, i32) {
    %c0_i32 = arith.constant 0 : i32
    %c0_i32_0 = arith.constant 0 : i32
    return %arg0, %arg1, %c0_i32 : i32, i32, i32
  }
}

</mosaic_0001>

<bundles_post_ra>
// kernel: tpu_custom_call.1
= control target key start
LH: loop header
LB: loop body
LE: loop exit
PB: predicated region body
PF: predicated region fallthrough
CT: control target
= control target key end

     0   :  { %9 = vsyncpa [#allocation4], 0  ;;  %s564_s0 = inlined_call_operand.hbm [shape: f32[2,8,32], index: 0, kind: input, shape index: {}]   ;;  %s565_s1 = inlined_call_operand.hbm [shape: f32[2,8,32], index: 1, kind: input, shape index: {}]   ;;  %s566_s2 = inlined_call_operand.hbm [shape: f32[32,32], index: 2, kind: input, shape index: {}]   ;;  %s567_s3 = inlined_call_operand.hbm [shape: f32[32,32], index: 3, kind: input, shape index: {}]   ;;  %s568_s4 = inlined_call_operand.hbm [shape: f32[2,8,32], index: 4, kind: output, shape index: {}]  }
   0x1   :  { %10 = vsyncpa [#allocation7], 0 }
   0x2   :  { %11 = vsyncpa [#allocation10], 0 }
   0x3   :  { %12 = vsyncpa [#allocation5], 0  ;;  %s30_s17 = sshll.u32 %s565_s1, 4  ;;  %s484_s18 = smov [#allocation6]   ;;  %s31_s17 = int_to_ptr.hbm [resolvable:$true] %s30_s17 }
   0x4   :  { %s32_s19 = sshll.u32 %s484_s18, 4  ;;  %s17_s22 = sshll.u32 %s564_s0, 4  ;;  %s33_s19 = int_to_ptr.vmem [resolvable:$true] %s32_s19  ;;  %s18_s22 = int_to_ptr.hbm [resolvable:$true] %s17_s22 }
   0x5   :  { %s485_s23 = smov 128   ;;  %s486_s24 = smov 8  }
   0x6   :  { %38 = dma.hbm_to_vmem [thread:$0]  %s31_s17, 256, %s33_s19, [#allocation7], %s485_s23, %s485_s23, %s486_s24  }
   0x7   :  { %s487_s25 = smov [#allocation3]   ;;  %s43_s1 = sshll.u32 %s566_s2, 4  ;;  %s44_s1 = int_to_ptr.hbm [resolvable:$true] %s43_s1 }
   0x8   :  { %s19_s26 = sshll.u32 %s487_s25, 4  ;;  %s56_s30 = sshll.u32 %s567_s3, 4  ;;  %s20_s26 = int_to_ptr.vmem [resolvable:$true] %s19_s26  ;;  %s57_s30 = int_to_ptr.hbm [resolvable:$true] %s56_s30 }
   0x9   :  { %25 = dma.hbm_to_vmem [thread:$0]  %s18_s22, 256, %s20_s26, [#allocation4], %s485_s23, %s485_s23, %s486_s24  }
   0xa   :  { %s488_s5 = smov [#allocation8]   ;;  %s489_s7 = smov [#allocation9]  }
   0xb   :  { %s45_s6 = sshll.u32 %s488_s5, 4  ;;  %s58_s2 = sshll.u32 %s489_s7, 4  ;;  %s46_s6 = int_to_ptr.vmem [resolvable:$true] %s45_s6  ;;  %s59_s2 = int_to_ptr.vmem [resolvable:$true] %s58_s2 }
   0xc   :  { %51 = dma.hbm_to_vmem [thread:$0]  %s44_s1, 512, %s46_s6, [#allocation7], %s485_s23, %s485_s23, %s486_s24  }
   0xd   :  { %64 = dma.hbm_to_vmem [thread:$0]  %s57_s30, 512, %s59_s2, [#allocation10], %s485_s23, %s485_s23, %s486_s24  }
   0xe   :  { %476 = dma.done.wait [#allocation4], 256  }
   0xf   :  { %477 = vsyncadd [#allocation4], 4294967040 }
  0x10   :  { %478 = dma.done.wait [#allocation7], 768  }
  0x11   :  { %479 = vsyncadd [#allocation7], 4294966528 }
  0x12   :  { %480 = dma.done.wait [#allocation10], 512  }
  0x13   :  { %481 = vsyncadd [#allocation10], 4294966784  ;;  %v90_v0 = vld [vmem:[#allocation8 + $0x18] sm:$0xff]  ;;  %v89_v1 = vld [vmem:[#allocation8 + $0x10] sm:$0xff]  ;;  %vm91_vm0 = vcmask 261120   ;;  %vm213_vm1 = vcmask 64512  }
  0x14   :  { %110 = vmatpush.msra.mxu0 %v90_v0  ;;  %v128_v2 = vld [vmem:[#allocation9 + $0x18] sm:$0xff]  ;;  %v88_v3 = vld [vmem:[#allocation8 + $0x8] sm:$0xff]  ;;  %v127_v4 = vld [vmem:[#allocation9 + $0x10] sm:$0xff]  ;;  %s490_s3 = smov [#allocation11]   ;;  %s316_s11 = sshll.u32 %s568_s4, 4  ;;  %s317_s11 = int_to_ptr.hbm [resolvable:$true] %s316_s11 }
  0x15   :  { %148 = vmatpush.msra.mxu1 %v128_v2  ;;  %v126_v5 = vld [vmem:[#allocation9 + $0x8] sm:$0xff]  ;;  %v87_v6 = vld [vmem:[#allocation8] sm:$0xff]  ;;  %v123_v9 = vld [vmem:[#allocation6] sm:$0xff]  ;;  %s314_s8 = sshll.u32 %s490_s3, 4  ;;  %s315_s8 = int_to_ptr.vmem [resolvable:$true] %s314_s8 }
  0x16   :  { %111 = vmatpush.msra.mxu0 %v89_v1  ;;  %v81_v7 = vld [vmem:[#allocation3] sm:$0xff]  ;;  %v82_v10 = vld [vmem:[#allocation3 + $0x8] sm:$0xff]  ;;  %v124_v11 = vld [vmem:[#allocation6 + $0x8] sm:$0xff] }
  0x17   :  { %149 = vmatpush.msra.mxu1 %v127_v4  ;;  %v125_v8 = vld [vmem:[#allocation9] sm:$0xff] }
  0x18   :  { %112 = vmatpush.msra.mxu0 %v88_v3 }
  0x19   :  { %150 = vmatpush.msra.mxu1 %v126_v5 }
  0x1a   :  { %113 = vmatpush.msra.mxu0 %v87_v6 }
  0x1b   :  { %331 = vmatmul.msk.f32.vlgmr.msra.gmra.mxu0 %vm91_vm0, %v81_v7  ;;  %151 = vmatpush.msra.mxu1 %v125_v8 }
  0x1c   :  { %333 = vmatmul.msk.f32.vlgmr.msra.gmra.mxu1 %vm91_vm0, %v123_v9 }
  0x23   :  { %332 = vmatmul.msk.f32.gmra.mxu0 %vm91_vm0, %v82_v10 }
  0x24   :  { %334 = vmatmul.msk.f32.gmra.mxu1 %vm91_vm0, %v124_v11 }
  0x98   :  { %v115_v12 = vpop.f32.mrf.mxu0 }
  0x99   :  { %121 = vst.msk [vmem:[#allocation2] sm:$0xff] %vm91_vm0, %v115_v12  ;;  %v153_v13 = vpop.f32.mrf.mxu1 }
  0xa0   :  { %v118_v14 = vpop.f32.mrf.mxu0  ;;  %v159_v15 = vld [vmem:[#allocation2] sm:$0xff] }
  0xa1   :  { %122 = vst.msk [vmem:[#allocation2 + $0x8] sm:$0xff] %vm91_vm0, %v118_v14  ;;  %335 = vmatpush.xpose.msk.msra.mxu2 %vm91_vm0, %v159_v15  ;;  %v156_v17 = vpop.f32.mrf.mxu1 }
  0xa4   :  { %336 = vmatmul.msk.f32.vlgmr.msra.gmra.mxu2 %vm91_vm0, %v153_v13 }
  0xa5   :  { %280 = vmatpush.msrb.mxu2 %v81_v7 }
  0xa8   :  { %v160_v16 = vld [vmem:[#allocation2 + $0x8] sm:$0xff] }
  0xa9   :  { %337 = vmatpush.xpose.msk.msra.mxu3 %vm91_vm0, %v160_v16 }
  0xac   :  { %338 = vmatmul.msk.f32.vlgmr.msra.gmra.mxu3 %vm91_vm0, %v156_v17 }
  0xad   :  { %303 = vmatpush.msrb.mxu3 %v82_v10 }
 0x127   :  { %v184_v18 = vpop.f32.mrf.mxu2 }
 0x128   :  { %v214_v19 = vsel %vm213_vm1, %v184_v18, -inf }
 0x129   :  { %215 = vmax.xlane.f32.xlu0 %v214_v19 }
 0x12f   :  { %v210_v20 = vpop.f32.mrf.mxu3 }
 0x130   :  { %v217_v21 = vsel %vm213_vm1, %v210_v20, -inf }
 0x131   :  { %218 = vmax.xlane.f32.xlu0 %v217_v21 }
 0x19c   :  { %v216_v22 = vpop.xlane.xlu0 %215 }
 0x19d   :  { %v220_v23 = vsub.f32 %v184_v18, %v216_v22 }
 0x19f   :  { %v222_v24 = vmul.f32 1.442695, %v220_v23 }
 0x1a1   :  { %348 = vpow2.f32 %v222_v24 }
 0x1a4   :  { %v219_v25 = vpop.xlane.xlu0 %218 }
 0x1a5   :  { %v221_v26 = vsub.f32 %v210_v20, %v219_v25 }
 0x1a7   :  { %v349_v27 = vpop.eup %348  ;;  %v224_v28 = vmul.f32 1.442695, %v221_v26 }
 0x1a8   :  { %v226_v29 = vsel %vm213_vm1, %v349_v27, 0.0 }
 0x1a9   :  { %350 = vpow2.f32 %v224_v28  ;;  %227 = vadd.xlane.f32.xlu1 %v226_v29 }
 0x1af   :  { %v351_v30 = vpop.eup %350 }
 0x1b0   :  { %v229_v31 = vsel %vm213_vm1, %v351_v30, 0.0 }
 0x1b1   :  { %230 = vadd.xlane.f32.xlu1 %v229_v31 }
 0x21c   :  { %v228_v32 = vpop.xlane.xlu1 %227 }
 0x21d   :  { %352 = vrcp.f32 %v228_v32  ;;  %v243_v37 = vand.u32 2147483648, %v228_v32  ;;  %v241_v39 = vand.u32 2147483647, %v228_v32  ;;  %vm237_vm3 = vweird.f32 %v228_v32 }
 0x21f   :  { %v244_v42 = vor.u32 1.1754944e-38, %v243_v37  ;;  %vm242_vm5 = vcmp.eq.f32.partialorder %v241_v39, 8.507059e+37 }
 0x223   :  { %v353_v33 = vpop.eup %352 }
 0x224   :  { %v233_v34 = vmul.f32 %v353_v33, %v228_v32  ;;  %v231_v35 = vpop.xlane.xlu1 %230  ;;  %vm238_vm2 = vweird.f32 %v353_v33 }
 0x225   :  { %354 = vrcp.f32 %v231_v35  ;;  %vm239_vm4 = vmor %vm237_vm3, %vm238_vm2  ;;  %v257_v48 = vand.u32 2147483648, %v231_v35  ;;  %v255_v50 = vand.u32 2147483647, %v231_v35  ;;  %vm251_vm7 = vweird.f32 %v231_v35 }
 0x226   :  { %v234_v36 = vsub.f32 1.0, %v233_v34 }
 0x227   :  { %v258_v52 = vor.u32 1.1754944e-38, %v257_v48  ;;  %vm256_vm9 = vcmp.eq.f32.partialorder %v255_v50, 8.507059e+37 }
 0x228   :  { %v235_v38 = vmul.f32 %v353_v33, %v234_v36 }
 0x22a   :  { %v236_v40 = vadd.f32 %v353_v33, %v235_v38 }
 0x22b   :  { %v355_v41 = vpop.eup %354 }
 0x22c   :  { %v247_v43 = vmul.f32 %v355_v41, %v231_v35  ;;  %v240_v44 = vsel %vm239_vm4, %v353_v33, %v236_v40  ;;  %vm252_vm6 = vweird.f32 %v355_v41 }
 0x22d   :  { %v245_v45 = vsel %vm242_vm5, %v244_v42, %v240_v44  ;;  %vm253_vm8 = vmor %vm251_vm7, %vm252_vm6 }
 0x22e   :  { %v248_v46 = vsub.f32 1.0, %v247_v43  ;;  %v260_v47 = vmul.f32 %v349_v27, %v245_v45 }
 0x230   :  { %v249_v49 = vmul.f32 %v355_v41, %v248_v46  ;;  %339 = vmatmul.msk.f32.vlgmr.msrb.gmra.mxu2 %vm213_vm1, %v260_v47 }
 0x232   :  { %v250_v51 = vadd.f32 %v355_v41, %v249_v49 }
 0x234   :  { %v254_v53 = vsel %vm253_vm8, %v355_v41, %v250_v51 }
 0x235   :  { %v259_v54 = vsel %vm256_vm9, %v258_v52, %v254_v53 }
 0x236   :  { %v261_v55 = vmul.f32 %v351_v30, %v259_v54 }
 0x238   :  { %340 = vmatmul.msk.f32.vlgmr.msrb.gmra.mxu3 %vm213_vm1, %v261_v55 }
 0x2b3   :  { %v282_v56 = vpop.f32.mrf.mxu2 }
 0x2b4   :  { %308 = vst.msk [vmem:[#allocation11] sm:$0xff] %vm91_vm0, %v282_v56 }
 0x2bb   :  { %v305_v57 = vpop.f32.mrf.mxu3 }
 0x2bc   :  { %309 = vst.msk [vmem:[#allocation11 + $0x8] sm:$0xff] %vm91_vm0, %v305_v57 }
 0x2bd   :  { %322 = dma.vmem_to_hbm [thread:$0]  %s315_s8, 256, %s317_s11, [#allocation5], %s485_s23, %s485_s23, %s486_s24  }
 0x2be   :  { %482 = dma.done.wait [#allocation5], 256  }
 0x2bf   :  { %483 = vsyncadd [#allocation5], 4294967040 }
 0x2c0   :  { %327 = vsyncpa [#allocation4], 1 }
 0x2c1   :  { %328 = vsyncpa [#allocation7], 1 }
 0x2c2   :  { %329 = vsyncpa [#allocation10], 1 }
 0x2c3   :  { %330 = vsyncpa [#allocation5], 1 }

</bundles_post_ra>
